<compile_context>
chip_gen: v7x
topology: tpu7x:2x2x1
jax: 0.10.0
libtpu: 0.0.40
codegen_flags: <defaults>
</compile_context>

<pallas_src>
import functools

import jax
import jax.numpy as jnp
from jax.experimental import pallas as pl
from jax.experimental.pallas import tpu as pltpu

_LANE = 128
_MAX_BLOCK_BYTES = 18 * 1024 * 1024    # features+mask per block (double-buffered <= 36 MiB)
_VMEM_LIMIT_BYTES = 48 * 1024 * 1024   # above v5e/v6e scoped defaults, below v7x physical 64 MiB


def _round_up(x, m):
    return ((x + m - 1) // m) * m


def _ceil_div(a, b):
    return -(-a // b)


def _min_value(dtype):
    dtype = jnp.dtype(dtype)
    if jnp.issubdtype(dtype, jnp.floating):
        return float("-inf")
    return int(jnp.iinfo(dtype).min)


def _num_tensorcores():
    """Heuristic TensorCores-per-device (grid 'parallel' sharding only helps there)."""
    try:
        kind = jax.devices()[0].device_kind.lower()
    except Exception:
        return 1
    if "v7" in kind or "v4" in kind or "v5p" in kind:
        return 2
    return 1


def _default_target_block_bytes():
    try:
        kind = jax.devices()[0].device_kind.lower()
    except Exception:
        kind = ""
    if "v7" in kind:
        return 12 * 1024 * 1024      # 3.2 TB/s HBM: big blocks, leave 64 MiB-VMEM headroom
    if "v5e" in kind or "v5 lite" in kind or "v5lite" in kind:
        return 6 * 1024 * 1024
    return 8 * 1024 * 1024           # v6e & others


def _choose_tiles(N, C, HW, itemsize, target_bytes, num_tc):
    """Pick (nb, thw). `target_bytes` budgets combined features+mask bytes per block."""
    budget = max(int(target_bytes), _LANE * (C + 1) * itemsize)
    budget = min(budget, _MAX_BLOCK_BYTES)
    row_bytes = (C + 1) * itemsize           # one HW element of features + mask
    per_sample = HW * row_bytes

    if per_sample <= budget:
        # Whole spatial extent per block: single HW chunk, no tail masking.
        thw = HW
        nb = max(1, min(N, budget // per_sample))
        if num_tc >= 2 and N >= 2:
            # Keep >= 2 batch blocks only where there are 2 TensorCores to use them.
            nb = min(nb, _ceil_div(N, 2))
        nb = _ceil_div(N, _ceil_div(N, nb))   # balance batch blocks
    else:
        nb = 1
        thw = (budget // row_bytes) // _LANE * _LANE
        thw = max(_LANE, thw)
        # Prefer >= 512-lane contiguous HBM runs when the budget allows it.
        if thw < 4 * _LANE and 4 * _LANE * row_bytes <= budget:
            thw = 4 * _LANE
        if thw >= HW:
            thw = HW
        else:
            # Balance HW chunks (keep a multiple of 128 lanes).
            thw = _round_up(_ceil_div(HW, _ceil_div(HW, thw)), _LANE)
            thw = min(thw, _round_up(HW, _LANE))
    return int(nb), int(thw)


def _aggregator_kernel(f_ref, m_ref, o_ref, *, hw, thw, kps, mask_tail, min_val):
    # f_ref: (nb, C, thw), m_ref: (nb, 1, thw), o_ref: (1, nb, C).
    # Grid: (split, batch-block, hw-chunk); o_ref persists across the hw axis.
    s = pl.program_id(0)
    k = pl.program_id(2)
    kk = s * kps + k                      # global HW-chunk index (may point past HW)

    @pl.when(k == 0)
    def _init():
        o_ref[...] = jnp.full_like(o_ref, min_val)

    x = f_ref[...] * m_ref[...]           # (nb, C, thw)  -- VPU, input dtype
    if mask_tail:
        # Invalid lanes (HW tail / phantom chunks / OOB garbage) must never win.
        lane = jax.lax.broadcasted_iota(jnp.int32, x.shape, dimension=2)
        x = jnp.where(lane < (hw - kk * thw), x, min_val)
    partial = jnp.max(x, axis=-1)         # (nb, C)       -- single XLU reduce per chunk
    o_ref[...] = jnp.maximum(o_ref[...], partial[None])


def aggregator_forward(features, mask, *, target_block_bytes=None, num_splits=None):
    """features: (N, C, H, W), mask: (N, 1, H, W) -> (N, C).

    Equivalent to Flatten(AdaptiveMaxPool2d((1,1))(features * mask)) with the
    default Identity shared_net / global_net.
    """
    # TODO(synk): shared_net / global_net are nn.Identity() by default; if
    # non-identity sub-networks were supplied they would need their own kernels.
    N, C, H, W = features.shape
    if N == 0 or features.size == 0:
        # Mirrors the torch `features.view(0, C)` path for empty inputs.
        return jnp.zeros((0, C), dtype=features.dtype)

    HW = H * W
    dtype = features.dtype
    itemsize = jnp.dtype(dtype).itemsize
    num_tc = _num_tensorcores()
    if target_block_bytes is None:
        target_block_bytes = _default_target_block_bytes()

    nb, thw = _choose_tiles(N, C, HW, itemsize, target_block_bytes, num_tc)
    n_blocks = _ceil_div(N, nb)
    k_blocks = _ceil_div(HW, thw)

    # v7x small-batch path: split the HW-chunk range across a leading
    # "parallel" axis so both TensorCores get work.
    if num_splits is None:
        num_splits = 2 if (num_tc >= 2 and n_blocks == 1 and k_blocks >= 2) else 1
    S = max(1, int(num_splits))
    kps = _ceil_div(k_blocks, S)          # HW chunks handled per split
    last_chunk = k_blocks - 1
    mask_tail = (S * kps * thw) > HW      # any invalid lanes anywhere?
    min_val = _min_value(dtype)

    f = features.reshape(N, C, HW)        # metadata-only reshape (no copy)
    m = mask.reshape(N, 1, HW).astype(dtype)

    kernel = functools.partial(
        _aggregator_kernel,
        hw=HW, thw=thw, kps=kps, mask_tail=mask_tail, min_val=min_val)

    def in_index(s, n, k):
        # Clamp phantom chunks (possible when k_blocks % S != 0) to the last
        # real chunk; their lanes are masked to min_val in-kernel anyway.
        return (n, 0, jnp.minimum(s * kps + k, last_chunk))

    out = pl.pallas_call(
        kernel,
        out_shape=jax.ShapeDtypeStruct((S, N, C), dtype),
        grid_spec=pltpu.PrefetchScalarGridSpec(
            num_scalar_prefetch=0,
            grid=(S, n_blocks, kps),
            in_specs=[
                pl.BlockSpec((nb, C, thw), in_index),
                pl.BlockSpec((nb, 1, thw), in_index),
            ],
            out_specs=pl.BlockSpec((1, nb, C), lambda s, n, k: (s, n, 0)),
        ),
        compiler_params=pltpu.CompilerParams(
            dimension_semantics=("parallel", "parallel", "arbitrary"),
            vmem_limit_bytes=_VMEM_LIMIT_BYTES,
        ),
        cost_estimate=pl.CostEstimate(
            flops=2 * N * C * HW,
            transcendentals=0,
            bytes_accessed=(N * C * HW + N * HW + S * N * C) * itemsize,
        ),
    )(f, m)

    if S > 1:
        return jnp.max(out, axis=0)       # combine per-split partial maxima (O(N*C))
    return out[0]


def _reference(features, mask):
    N, C = features.shape[0], features.shape[1]
    return jnp.max((features * mask).reshape(N, C, -1), axis=-1)


if __name__ == "__main__":
    key = jax.random.PRNGKey(0)
    kf, km, kf2, km2, kf3, km3 = jax.random.split(key, 6)

    # Test 1: module-typical small shape, default (auto) tiling.
    N, C, H, W = 2, 4, 16, 16
    features = jax.random.normal(kf, (N, C, H, W), dtype=jnp.float32)
    mask = (jax.random.uniform(km, (N, 1, H, W)) > 0.5).astype(jnp.float32)
    out = jax.block_until_ready(aggregator_forward(features, mask))
    ref = _reference(features, mask)
    assert out.shape == (N, C)
    assert jnp.allclose(out, ref, atol=1e-6), "mismatch vs reference (test 1)"

    # Test 2: odd spatial size + tiny block budget + forced 2-way HW split ->
    # exercises HW tiling, in-kernel tail masking, multi-chunk accumulation,
    # phantom-chunk clamping (3 chunks over 2 splits) and the split-combine path.
    N2, C2, H2, W2 = 5, 8, 18, 18
    features2 = jax.random.normal(kf2, (N2, C2, H2, W2), dtype=jnp.float32)
    mask2 = (jax.random.uniform(km2, (N2, 1, H2, W2)) > 0.5).astype(jnp.float32)
    out2 = jax.block_until_ready(
        aggregator_forward(features2, mask2, target_block_bytes=4096, num_splits=2))
    ref2 = _reference(features2, mask2)
    assert out2.shape == (N2, C2)
    assert jnp.allclose(out2, ref2, atol=1e-6), "mismatch vs reference (test 2)"

    # Test 3: batch-remainder block (N=5, nb=2, no HW tiling) -> exercises the
    # unspecified-data batch tail being dropped by the masked output writeback.
    N3, C3, H3, W3 = 5, 4, 8, 8
    features3 = jax.random.normal(kf3, (N3, C3, H3, W3), dtype=jnp.float32)
    mask3 = (jax.random.uniform(km3, (N3, 1, H3, W3)) > 0.5).astype(jnp.float32)
    per_sample3 = (C3 + 1) * H3 * W3 * 4
    out3 = jax.block_until_ready(
        aggregator_forward(features3, mask3, target_block_bytes=2 * per_sample3))
    ref3 = _reference(features3, mask3)
    assert out3.shape == (N3, C3)
    assert jnp.allclose(out3, ref3, atol=1e-6), "mismatch vs reference (test 3)"

    print("KERNEL_OK")
</pallas_src>

<mosaic_0001>
module attributes {stable_mosaic.version = 11 : i64} {
  func.func @_aggregator_kernel(%arg0: i32, %arg1: i32, %arg2: i32, %arg3: memref<2x4x256xf32, #tpu.memory_space<vmem>>, %arg4: memref<2x1x256xf32, #tpu.memory_space<vmem>>, %arg5: memref<1x2x4xf32, #tpu.memory_space<vmem>>) attributes {dimension_semantics = [#tpu.dimension_semantics<parallel>, #tpu.dimension_semantics<parallel>, #tpu.dimension_semantics<arbitrary>], iteration_bounds = array<i64: 1, 1, 1>, scalar_prefetch = 0 : i64, scratch_operands = 0 : i64, tpu.core_type = #tpu.core_type<tc>, window_params = [{transform_indices = @transform_0, window_bounds = array<i64: 2, 4, 256>}, {transform_indices = @transform_1, window_bounds = array<i64: 2, 1, 256>}, {transform_indices = @transform_2, window_bounds = array<i64: 1, 2, 4>}]} {
    %c0_i32 = arith.constant 0 : i32
    %0 = arith.cmpi eq, %arg2, %c0_i32 : i32
    %1 = arith.extui %0 : i1 to i32
    %c0_i32_0 = arith.constant 0 : i32
    %2 = arith.cmpi ne, %1, %c0_i32_0 : i32
    scf.if %2 {
      %cst_12 = arith.constant 0xFF800000 : f32
      %12 = vector.broadcast %cst_12 : f32 to vector<1x2x4xf32>
      %c0_13 = arith.constant 0 : index
      %c0_14 = arith.constant 0 : index
      %c0_15 = arith.constant 0 : index
      %13 = vector.load %arg5[%c0_13, %c0_14, %c0_15] : memref<1x2x4xf32, #tpu.memory_space<vmem>>, vector<1x2x4xf32>
      tpu.vector_store %arg5[%c0_13, %c0_14, %c0_15], %12 {strides = array<i32>} : memref<1x2x4xf32, #tpu.memory_space<vmem>>, vector<1x2x4xf32>,
    } else {
    }
    %c0 = arith.constant 0 : index
    %c0_1 = arith.constant 0 : index
    %c0_2 = arith.constant 0 : index
    %3 = vector.load %arg3[%c0, %c0_1, %c0_2] : memref<2x4x256xf32, #tpu.memory_space<vmem>>, vector<2x4x256xf32>
    %c0_3 = arith.constant 0 : index
    %c0_4 = arith.constant 0 : index
    %c0_5 = arith.constant 0 : index
    %4 = vector.load %arg4[%c0_3, %c0_4, %c0_5] : memref<2x1x256xf32, #tpu.memory_space<vmem>>, vector<2x1x256xf32>
    %5 = vector.broadcast %4 : vector<2x1x256xf32> to vector<2x4x256xf32>
    %6 = arith.mulf %3, %5 : vector<2x4x256xf32>
    %cst = arith.constant dense<0xFF800000> : vector<2x4xf32>
    %7 = vector.multi_reduction <maximumf>, %6, %cst [2] : vector<2x4x256xf32> to vector<2x4xf32>
    %c0_6 = arith.constant 0 : index
    %c0_7 = arith.constant 0 : index
    %c0_8 = arith.constant 0 : index
    %8 = vector.load %arg5[%c0_6, %c0_7, %c0_8] : memref<1x2x4xf32, #tpu.memory_space<vmem>>, vector<1x2x4xf32>
    %9 = vector.shape_cast %7 : vector<2x4xf32> to vector<1x2x4xf32>
    %10 = arith.maximumf %8, %9 : vector<1x2x4xf32>
    %c0_9 = arith.constant 0 : index
    %c0_10 = arith.constant 0 : index
    %c0_11 = arith.constant 0 : index
    %11 = vector.load %arg5[%c0_9, %c0_10, %c0_11] : memref<1x2x4xf32, #tpu.memory_space<vmem>>, vector<1x2x4xf32>
    tpu.vector_store %arg5[%c0_9, %c0_10, %c0_11], %10 {strides = array<i32>} : memref<1x2x4xf32, #tpu.memory_space<vmem>>, vector<1x2x4xf32>,
    return
  }
  func.func @transform_0(%arg0: i32, %arg1: i32, %arg2: i32) -> (i32, i32, i32) {
    %c1_i32 = arith.constant 1 : i32
    %0 = arith.muli %arg0, %c1_i32 : i32
    %1 = arith.addi %0, %arg2 : i32
    %c0_i32 = arith.constant 0 : i32
    %2 = arith.minsi %1, %c0_i32 : i32
    %c0_i32_0 = arith.constant 0 : i32
    %c0_i32_1 = arith.constant 0 : i32
    return %arg1, %c0_i32_0, %2 : i32, i32, i32
  }
  func.func @transform_1(%arg0: i32, %arg1: i32, %arg2: i32) -> (i32, i32, i32) {
    %c1_i32 = arith.constant 1 : i32
    %0 = arith.muli %arg0, %c1_i32 : i32
    %1 = arith.addi %0, %arg2 : i32
    %c0_i32 = arith.constant 0 : i32
    %2 = arith.minsi %1, %c0_i32 : i32
    %c0_i32_0 = arith.constant 0 : i32
    %c0_i32_1 = arith.constant 0 : i32
    return %arg1, %c0_i32_0, %2 : i32, i32, i32
  }
  func.func @transform_2(%arg0: i32, %arg1: i32, %arg2: i32) -> (i32, i32, i32) {
    %c0_i32 = arith.constant 0 : i32
    %c0_i32_0 = arith.constant 0 : i32
    return %arg0, %arg1, %c0_i32 : i32, i32, i32
  }
}

</mosaic_0001>

<bundles_post_ra>
// kernel: tpu_custom_call.1
= control target key start
LH: loop header
LB: loop body
LE: loop exit
PB: predicated region body
PF: predicated region fallthrough
CT: control target
= control target key end

     0   :  { %7 = vsyncpa [#allocation3], 0  ;;  %s291_s0 = inlined_call_operand.hbm [shape: f32[2,4,256], index: 0, kind: input, shape index: {}]   ;;  %s292_s1 = inlined_call_operand.hbm [shape: f32[2,1,256], index: 1, kind: input, shape index: {}]   ;;  %s293_s2 = inlined_call_operand.hbm [shape: f32[1,2,4], index: 2, kind: output, shape index: {}]  }
   0x1   :  { %8 = vsyncpa [#allocation6], 0 }
   0x2   :  { %9 = vsyncpa [#allocation4], 0  ;;  %s230_s9 = smov [#allocation2]   ;;  %s158_s13 = scalar_lea.hbm %s291_s0, 256 }
   0x3   :  { %s21_s10 = sshll.u32 %s230_s9, 4  ;;  %p159_p0 = scmp.ne.s32.totalorder %s291_s0, %s158_s13  ;;  %s22_s10 = int_to_ptr.vmem [resolvable:$true] %s21_s10 }
   0x4   :  { %p162_p1 = scmp.lt.u32.totalorder %s158_s13, %s291_s0 }
   0x6   :  { %p164_p2 = pnand %p162_p1, %p159_p0 }
   0x8   :  { %167 = shalt.err (!%p164_p2)
}
   0x9   :  { %s168_s18 = scalar_lea.vmem %s22_s10, 256  ;;  %p173_p4 = scmp.lt.s32.totalorder %s22_s10, %s22_s10 }
   0xa   :  { %p169_p3 = scmp.ne.s32.totalorder %s22_s10, %s168_s18  ;;  %p174_p5 = scmp.lt.s32.totalorder %s168_s18, %s168_s18 }
   0xc   :  { %p175_p6 = por %p174_p5, %p173_p4 }
   0xe   :  { %p176_p7 = pnand %p175_p6, %p169_p3 }
  0x10   :  { %179 = shalt.err (!%p176_p7)
}
  0x11   :  { %s231_s19 = smov 128   ;;  %s232_s20 = smov 8  }
  0x12   :  { %27 = dma.hbm_to_vmem [thread:$0]  %s291_s0, 256, %s22_s10, [#allocation3], %s231_s19, %s231_s19, %s232_s20  }
  0x13   :  { %s233_s23 = smov [#allocation5]   ;;  %s180_s27 = scalar_lea.hbm %s292_s1, 64 }
  0x14   :  { %s39_s24 = sshll.u32 %s233_s23, 4  ;;  %p181_p8 = scmp.ne.s32.totalorder %s292_s1, %s180_s27  ;;  %s40_s24 = int_to_ptr.vmem [resolvable:$true] %s39_s24 }
  0x15   :  { %p184_p9 = scmp.lt.u32.totalorder %s180_s27, %s292_s1 }
  0x17   :  { %p186_p10 = pnand %p184_p9, %p181_p8 }
  0x19   :  { %189 = shalt.err (!%p186_p10)
}
  0x1a   :  { %s190_s4 = scalar_lea.vmem %s40_s24, 64  ;;  %p195_p12 = scmp.lt.s32.totalorder %s40_s24, %s40_s24 }
  0x1b   :  { %p191_p11 = scmp.ne.s32.totalorder %s40_s24, %s190_s4  ;;  %p196_p13 = scmp.lt.s32.totalorder %s190_s4, %s190_s4 }
  0x1d   :  { %p197_p0 = por %p196_p13, %p195_p12 }
  0x1f   :  { %p198_p1 = pnand %p197_p0, %p191_p11 }
  0x21   :  { %201 = shalt.err (!%p198_p1)
}
  0x22   :  { %s234_s0 = smov 32   ;;  %s235_s5 = smov 2  }
  0x23   :  { %45 = dma.hbm_to_vmem [thread:$0]  %s292_s1, 64, %s40_s24, [#allocation6], %s234_s0, %s234_s0, %s235_s5  }
  0x24   :  { %224 = dma.done.wait [#allocation3], 256  }
  0x25   :  { %225 = vsyncadd [#allocation3], 4294967040 }
  0x26   :  { %226 = dma.done.wait [#allocation6], 64  }
  0x27   :  { %227 = vsyncadd [#allocation6], 4294967232  ;;  %vm64_vm0 = vcmask 25600   ;;  %v72_v0 = vlaneseq  ;;  %v236_v1 = vmov -inf   ;;  %v68_v7 = vld [vmem:[#allocation5] sm:$0x3] }
  0x28   :  { %65 = vst.msk [vmem:[#allocation7] sm:$0x3] %vm64_vm0, %v236_v1  ;;  %v69_v10 = vld [vmem:[#allocation5 + $0x2] sm:$0x3]  ;;  %v66_v11 = vld [vmem:[#allocation2] sm:$0xff]  ;;  %v67_v15 = vld [vmem:[#allocation2 + $0x8] sm:$0xff] }
  0x29   :  { %v73_v2 = vshrl.u32 %v72_v0, 7  ;;  %v115_v3 = vand.u32 127, %v72_v0  ;;  %vm100_vm1 = vcmask 1043456   ;;  %vm124_vm2 = vcmask 1041409   ;;  %s237_s1 = smov [#allocation7]  }
  0x2a   :  { %s136_s8 = sshll.u32 %s237_s1, 4  ;;  %s137_s8 = int_to_ptr.vmem [resolvable:$true] %s136_s8 }
  0x2b   :  { %v74_v4 = vsub.s32 0, %v73_v2  ;;  %v78_v5 = vsub.s32 1, %v73_v2  ;;  %v118_v6 = vsub.s32 %v115_v3, %v73_v2  ;;  %s202_s9 = scalar_lea.vmem %s137_s8, 32  ;;  %p207_p3 = scmp.lt.s32.totalorder %s137_s8, %s137_s8 }
  0x2c   :  { %p203_p2 = scmp.ne.s32.totalorder %s137_s8, %s202_s9  ;;  %p208_p4 = scmp.lt.s32.totalorder %s202_s9, %s202_s9 }
  0x2d   :  { %v75_v8 = vrot.slane %v68_v7, %v74_v4  ;;  %v79_v9 = vrot.slane %v68_v7, %v78_v5  ;;  %v83_v12 = vrot.slane %v69_v10, %v74_v4  ;;  %v87_v13 = vrot.slane %v69_v10, %v78_v5 }
  0x2e   :  { %p209_p5 = por %p208_p4, %p207_p3 }
  0x2f   :  { %v88_v14 = vcombine.low %v75_v8, %v79_v9  ;;  %v89_v16 = vcombine.low %v83_v12, %v87_v13  ;;  %v111_v30 = vld [vmem:[#allocation7] sm:$0x3] }
  0x30   :  { %p210_p6 = pnand %p209_p5, %p203_p2 }
  0x31   :  { %v92_v17 = vmul.f32 %v88_v14, %v66_v11  ;;  %v93_v18 = vmul.f32 %v89_v16, %v67_v15 }
  0x33   :  { %v96_v19 = vcombine.high %v92_v17, %v92_v17  ;;  %v101_v20 = vsel %vm100_vm1, %v92_v17, -inf  ;;  %v97_v21 = vcombine.high %v93_v18, %v93_v18  ;;  %v106_v23 = vsel %vm100_vm1, %v93_v18, -inf }
  0x35   :  { %v102_v22 = vsel %vm100_vm1, %v96_v19, -inf  ;;  %v107_v25 = vsel %vm100_vm1, %v97_v21, -inf }
  0x36   :  { %v103_v24 = vmax.f32 %v101_v20, %v102_v22  ;;  %v108_v26 = vmax.f32 %v106_v23, %v107_v25 }
  0x38   :  { %104 = vmax.xlane.f32.xlu0 %v103_v24 }
  0x3c   :  { %109 = vmax.xlane.f32.xlu0 %v108_v26 }
  0xc5   :  { %v105_v27 = vpop.xlane.xlu0 %104 }
  0xc6   :  { %v119_v29 = vrot.slane %v105_v27, %v118_v6 }
  0xc9   :  { %v110_v28 = vpop.xlane.xlu0 %109 }
  0xca   :  { %v123_v31 = vrot.slane %v110_v28, %v118_v6 }
  0xcc   :  { %v125_v32 = vsel %vm124_vm2, %v123_v31, %v119_v29 }
  0xcd   :  { %v127_v33 = vmax.f32 %v111_v30, %v125_v32 }
  0xcf   :  { %129 = vst.msk [vmem:[#allocation7] sm:$0x3] %vm64_vm0, %v127_v33 }
  0xd0   :  { %213 = shalt.err (!%p210_p6)
}
  0xd1   :  { %s214_s12 = scalar_lea.hbm %s293_s2, 32 }
  0xd2   :  { %p215_p7 = scmp.ne.s32.totalorder %s293_s2, %s214_s12  ;;  %p218_p8 = scmp.lt.u32.totalorder %s214_s12, %s293_s2 }
  0xd4   :  { %p220_p9 = pnand %p218_p8, %p215_p7 }
  0xd6   :  { %223 = shalt.err (!%p220_p9)
}
  0xd7   :  { %139 = dma.vmem_to_hbm [thread:$0]  %s137_s8, 32, %s293_s2, [#allocation4]  }
  0xd8   :  { %228 = dma.done.wait [#allocation4], 32  }
  0xd9   :  { %229 = vsyncadd [#allocation4], 4294967264 }
  0xda   :  { %143 = vsyncpa [#allocation3], 1 }
  0xdb   :  { %144 = vsyncpa [#allocation6], 1 }
  0xdc   :  { %145 = vsyncpa [#allocation4], 1 }

</bundles_post_ra>
